<compile_context>
chip_gen: v7x
topology: tpu7x:2x2x1
jax: 0.10.0
libtpu: 0.0.40
codegen_flags: <defaults>
</compile_context>

<pallas_src>
import functools

import jax
import jax.numpy as jnp
from jax.experimental import pallas as pl
from jax.experimental.pallas import tpu as pltpu


def _round_up(v, m):
    return (v + m - 1) // m * m


def _vmem_budget_bytes():
    """Real per-core VMEM capacity minus ~8 MiB headroom (v7x-safe)."""
    try:
        cap = int(pltpu.get_tpu_info().vmem_capacity_bytes)
    except Exception:
        cap = 64 << 20          # conservative fallback: v7x per-TensorCore
    return max(cap - (8 << 20), 16 << 20)


def _vmem_footprint(tm, ti, H, x_bytes, out_bytes):
    """Double-buffered block footprint + f32 accumulator, in bytes."""
    x_blk = tm * H * x_bytes * 2          # input rows (original dtype)
    wgu_blk = H * (2 * ti) * 2 * 2        # fused gate/up slab, bf16
    wd_blk = ti * H * 2 * 2               # down-proj slab, bf16
    out_blk = tm * H * out_bytes * 2      # output rows (original dtype)
    acc = tm * H * 4                      # f32 scratch (single buffer)
    return x_blk + wgu_blk + wd_blk + out_blk + acc


def _mlp_kernel(x_ref, wgu_ref, wd_ref, o_ref, acc_ref, *, ti):
    """One (row-tile, intermediate-tile) step of the MLP.

    x_ref   : (TM, H)      input rows, original dtype (cast to bf16 in VMEM)
    wgu_ref : (H, 2*TI)    fused [gate | up] bf16 slab for this I tile
    wd_ref  : (TI, H)      down-proj bf16 slab for this I tile
    o_ref   : (TM, H)      output rows (written on last I step)
    acc_ref : (TM, H)      f32 accumulator scratch
    """
    ki = pl.program_id(1)

    @pl.when(ki == 0)
    def _():
        acc_ref[...] = jnp.zeros_like(acc_ref)

    x = x_ref[...].astype(jnp.bfloat16)
    gu = jnp.dot(x, wgu_ref[...], preferred_element_type=jnp.float32)  # (TM, 2*TI)
    gate = gu[:, :ti]
    up = gu[:, ti:]
    act = gate * jax.nn.sigmoid(gate) * up                # SiLU(gate) * up, f32
    acc_ref[...] += jnp.dot(act.astype(wd_ref.dtype), wd_ref[...],
                            preferred_element_type=jnp.float32)

    @pl.when(ki == pl.num_programs(1) - 1)
    def _():
        o_ref[...] = acc_ref[...].astype(o_ref.dtype)


def prepare_mlp_weights(gate_w, up_w, down_w, *, tile_i=512):
    """One-time weight prep (keep OFF the per-call hot path).

    gate_w, up_w : (I, H) PyTorch nn.Linear layout (out, in)
    down_w       : (H, I)
    tile_i       : intermediate tile size (multiple of 128).  Use 256 on v7x
                   if larger row tiles need the VMEM headroom.

    Returns (wgu, wd_t, ti):
      wgu  : (H, 2*Ip) bf16, per-tile interleaved [gate_blk | up_blk] * nb
      wd_t : (Ip, H)   bf16
      ti   : the intermediate tile size baked into wgu's layout
    """
    I, H = gate_w.shape
    wg_t = jnp.asarray(gate_w).T.astype(jnp.bfloat16)     # (H, I)
    wu_t = jnp.asarray(up_w).T.astype(jnp.bfloat16)       # (H, I)
    wd_t = jnp.asarray(down_w).T.astype(jnp.bfloat16)     # (I, H)

    if I <= tile_i:
        ti, Ip = I, I
    else:
        ti = tile_i
        Ip = _round_up(I, ti)
        if Ip != I:
            # Zero-padded gate/up columns give SiLU(0)*0 = 0, and the padded
            # down-proj rows are zero as well -> exact zero contribution.
            wg_t = jnp.pad(wg_t, ((0, 0), (0, Ip - I)))
            wu_t = jnp.pad(wu_t, ((0, 0), (0, Ip - I)))
            wd_t = jnp.pad(wd_t, ((0, Ip - I), (0, 0)))

    nb = Ip // ti
    wg_b = wg_t.reshape(H, nb, ti)
    wu_b = wu_t.reshape(H, nb, ti)
    # (H, nb, 2, ti) -> (H, 2*Ip): block ki holds [gate block ki | up block ki]
    wgu = jnp.stack([wg_b, wu_b], axis=2).reshape(H, 2 * Ip)
    return wgu, wd_t, ti


def vishwamai_mlp_forward(x, wgu, wd_t, ti, *, tile_m=None):
    """x: [..., H].  wgu: (H, 2*Ip) bf16 fused gate/up.  wd_t: (Ip, H) bf16.

    tile_m=None auto-picks the largest row tile that fits VMEM; weight HBM
    traffic scales as 1/tile_m, so bigger is better on every generation.
    """
    orig_shape = x.shape
    H = orig_shape[-1]
    M = 1
    for d in orig_shape[:-1]:
        M *= d
    Ip = wd_t.shape[0]
    assert wgu.shape == (H, 2 * Ip)
    assert Ip % ti == 0

    x2d = x.reshape(M, H)                       # keep original dtype; cast in VMEM
    x_bytes = x2d.dtype.itemsize
    out_bytes = x2d.dtype.itemsize

    # --- row tiling: largest tm (multiple of 16) whose footprint fits VMEM ---
    budget = _vmem_budget_bytes()
    m_cap = _round_up(M, 16)
    if tile_m is not None:
        candidates = [_round_up(min(tile_m, m_cap), 16)]
    else:
        candidates = []
        for c in (1024, 512, 256, 128, 64, 32, 16):
            c = min(c, m_cap)
            if c not in candidates:
                candidates.append(c)
    tm = candidates[-1]
    for c in candidates:
        if _vmem_footprint(c, ti, H, x_bytes, out_bytes) + (4 << 20) <= budget:
            tm = c
            break

    Mp = _round_up(M, tm)
    if Mp != M:
        x2d = jnp.pad(x2d, ((0, Mp - M), (0, 0)))   # zero rows -> zero output rows

    grid = (Mp // tm, Ip // ti)

    foot = _vmem_footprint(tm, ti, H, x_bytes, out_bytes)
    vmem_bytes = int(min(max(foot + (4 << 20), 16 << 20), budget))

    n_m_tiles = Mp // tm
    cost = pl.CostEstimate(
        flops=int(6 * M * H * Ip),                     # gate+up+down matmuls
        transcendentals=int(M * Ip),                   # sigmoid
        bytes_accessed=int(
            M * H * x_bytes                            # read x
            + n_m_tiles * (3 * H * Ip) * 2             # weights re-read per M tile
            + M * H * out_bytes                        # write output
        ),
    )

    out2d = pl.pallas_call(
        functools.partial(_mlp_kernel, ti=ti),
        out_shape=jax.ShapeDtypeStruct((Mp, H), x.dtype),
        grid_spec=pltpu.PrefetchScalarGridSpec(
            num_scalar_prefetch=0,
            grid=grid,
            in_specs=[
                pl.BlockSpec((tm, H), lambda mi, ki: (mi, 0)),       # x rows
                pl.BlockSpec((H, 2 * ti), lambda mi, ki: (0, ki)),   # fused gate/up
                pl.BlockSpec((ti, H), lambda mi, ki: (ki, 0)),       # down-proj
            ],
            out_specs=pl.BlockSpec((tm, H), lambda mi, ki: (mi, 0)),
            scratch_shapes=[pltpu.VMEM((tm, H), jnp.float32)],
        ),
        compiler_params=pltpu.CompilerParams(
            dimension_semantics=("parallel", "arbitrary"),
            vmem_limit_bytes=vmem_bytes,
        ),
        cost_estimate=cost,
    )(x2d, wgu, wd_t)

    return out2d[:M].reshape(orig_shape)


def _reference_forward(x, gate_w, up_w, down_w):
    """Pure-JAX reference: same bf16 matmul inputs / f32 accumulation."""
    orig_shape = x.shape
    H = orig_shape[-1]
    xb = x.reshape(-1, H).astype(jnp.bfloat16)
    gate = jnp.dot(xb, gate_w.T.astype(jnp.bfloat16),
                   preferred_element_type=jnp.float32)
    up = jnp.dot(xb, up_w.T.astype(jnp.bfloat16),
                 preferred_element_type=jnp.float32)
    act = gate * jax.nn.sigmoid(gate) * up
    out = jnp.dot(act.astype(jnp.bfloat16), down_w.T.astype(jnp.bfloat16),
                  preferred_element_type=jnp.float32)
    return out.astype(x.dtype).reshape(orig_shape)


if __name__ == "__main__":
    # Small config consistent with the module (scaled-down hidden/intermediate).
    B, S, H, I = 2, 8, 128, 256

    key = jax.random.PRNGKey(0)
    kx, k1, k2, k3 = jax.random.split(key, 4)
    x = jax.random.normal(kx, (B, S, H), jnp.float32)

    # PyTorch nn.Linear layout: weight is (out_features, in_features), no bias.
    scale = 0.02
    gate_w = scale * jax.random.normal(k1, (I, H), jnp.float32)
    up_w = scale * jax.random.normal(k2, (I, H), jnp.float32)
    down_w = scale * jax.random.normal(k3, (H, I), jnp.float32)

    # One-time weight prep (transpose + bf16 cast + fuse/pad) off the hot path.
    wgu, wd_t, ti = prepare_mlp_weights(gate_w, up_w, down_w, tile_i=512)

    out = vishwamai_mlp_forward(x, wgu, wd_t, ti)
    out = jax.block_until_ready(out)

    ref = _reference_forward(x, gate_w, up_w, down_w)
    assert out.shape == (B, S, H)
    assert jnp.allclose(out, ref, atol=1e-2, rtol=1e-2), "mismatch vs JAX reference"

    print("KERNEL_OK")
</pallas_src>

<mosaic_0001>
module attributes {stable_mosaic.version = 11 : i64} {
  func.func @_mlp_kernel(%arg0: i32, %arg1: i32, %arg2: memref<16x128xf32, #tpu.memory_space<vmem>>, %arg3: memref<128x512xbf16, #tpu.memory_space<vmem>>, %arg4: memref<256x128xbf16, #tpu.memory_space<vmem>>, %arg5: memref<16x128xf32, #tpu.memory_space<vmem>>, %arg6: memref<16x128xf32, #tpu.memory_space<vmem>>) attributes {dimension_semantics = [#tpu.dimension_semantics<parallel>, #tpu.dimension_semantics<arbitrary>], iteration_bounds = array<i64: 1, 1>, scalar_prefetch = 0 : i64, scratch_operands = 1 : i64, tpu.core_type = #tpu.core_type<tc>, window_params = [{transform_indices = @transform_0, window_bounds = array<i64: 16, 128>}, {transform_indices = @transform_1, window_bounds = array<i64: 128, 512>}, {transform_indices = @transform_2, window_bounds = array<i64: 256, 128>}, {transform_indices = @transform_3, window_bounds = array<i64: 16, 128>}]} {
    %c0_i32 = arith.constant 0 : i32
    %0 = arith.cmpi eq, %arg1, %c0_i32 : i32
    %1 = arith.extui %0 : i1 to i32
    %c0_i32_0 = arith.constant 0 : i32
    %2 = arith.cmpi ne, %1, %c0_i32_0 : i32
    scf.if %2 {
      %cst_14 = arith.constant 0.000000e+00 : f32
      %25 = vector.broadcast %cst_14 : f32 to vector<16x128xf32>
      %c0_15 = arith.constant 0 : index
      %c0_16 = arith.constant 0 : index
      %26 = vector.load %arg6[%c0_15, %c0_16] : memref<16x128xf32, #tpu.memory_space<vmem>>, vector<16x128xf32>
      tpu.vector_store %arg6[%c0_15, %c0_16], %25 {strides = array<i32>} : memref<16x128xf32, #tpu.memory_space<vmem>>, vector<16x128xf32>,
    } else {
    }
    %c0 = arith.constant 0 : index
    %c0_1 = arith.constant 0 : index
    %3 = vector.load %arg2[%c0, %c0_1] : memref<16x128xf32, #tpu.memory_space<vmem>>, vector<16x128xf32>
    %4 = arith.truncf %3 : vector<16x128xf32> to vector<16x128xbf16>
    %c0_2 = arith.constant 0 : index
    %c0_3 = arith.constant 0 : index
    %5 = vector.load %arg3[%c0_2, %c0_3] : memref<128x512xbf16, #tpu.memory_space<vmem>>, vector<128x512xbf16>
    %cst = arith.constant dense<0.000000e+00> : vector<16x512xf32>
    %6 = tpu.matmul %4, %5, %cst {dimension_numbers = #tpu.dot_dimension_numbers<[1], [0], [0], [1], [0, 0, 1, 1], [], []>} : vector<16x128xbf16>, vector<128x512xbf16>, vector<16x512xf32> -> vector<16x512xf32>
    %7 = vector.extract_strided_slice %6 {offsets = [0, 0], sizes = [16, 256], strides = [1, 1]} : vector<16x512xf32> to vector<16x256xf32>
    %8 = vector.extract_strided_slice %6 {offsets = [0, 256], sizes = [16, 256], strides = [1, 1]} : vector<16x512xf32> to vector<16x256xf32>
    %9 = arith.negf %7 : vector<16x256xf32>
    %10 = math.exp %9 : vector<16x256xf32>
    %cst_4 = arith.constant 1.000000e+00 : f32
    %11 = vector.broadcast %cst_4 : f32 to vector<16x256xf32>
    %12 = arith.addf %11, %10 : vector<16x256xf32>
    %13 = arith.divf %11, %12 : vector<16x256xf32>
    %14 = arith.mulf %7, %13 : vector<16x256xf32>
    %15 = arith.mulf %14, %8 : vector<16x256xf32>
    %c0_5 = arith.constant 0 : index
    %c0_6 = arith.constant 0 : index
    %16 = vector.load %arg6[%c0_5, %c0_6] : memref<16x128xf32, #tpu.memory_space<vmem>>, vector<16x128xf32>
    %17 = arith.truncf %15 : vector<16x256xf32> to vector<16x256xbf16>
    %c0_7 = arith.constant 0 : index
    %c0_8 = arith.constant 0 : index
    %18 = vector.load %arg4[%c0_7, %c0_8] : memref<256x128xbf16, #tpu.memory_space<vmem>>, vector<256x128xbf16>
    %cst_9 = arith.constant dense<0.000000e+00> : vector<16x128xf32>
    %19 = tpu.matmul %17, %18, %cst_9 {dimension_numbers = #tpu.dot_dimension_numbers<[1], [0], [0], [1], [0, 0, 1, 1], [], []>} : vector<16x256xbf16>, vector<256x128xbf16>, vector<16x128xf32> -> vector<16x128xf32>
    %20 = arith.addf %16, %19 : vector<16x128xf32>
    %c0_10 = arith.constant 0 : index
    %c0_11 = arith.constant 0 : index
    %21 = vector.load %arg6[%c0_10, %c0_11] : memref<16x128xf32, #tpu.memory_space<vmem>>, vector<16x128xf32>
    tpu.vector_store %arg6[%c0_10, %c0_11], %20 {strides = array<i32>} : memref<16x128xf32, #tpu.memory_space<vmem>>, vector<16x128xf32>,
    %c0_i32_12 = arith.constant 0 : i32
    %22 = arith.cmpi eq, %arg1, %c0_i32_12 : i32
    %23 = arith.extui %22 : i1 to i32
    %c0_i32_13 = arith.constant 0 : i32
    %24 = arith.cmpi ne, %23, %c0_i32_13 : i32
    scf.if %24 {
      %c0_14 = arith.constant 0 : index
      %c0_15 = arith.constant 0 : index
      %25 = vector.load %arg6[%c0_14, %c0_15] : memref<16x128xf32, #tpu.memory_space<vmem>>, vector<16x128xf32>
      %c0_16 = arith.constant 0 : index
      %c0_17 = arith.constant 0 : index
      %26 = vector.load %arg5[%c0_16, %c0_17] : memref<16x128xf32, #tpu.memory_space<vmem>>, vector<16x128xf32>
      tpu.vector_store %arg5[%c0_16, %c0_17], %25 {strides = array<i32>} : memref<16x128xf32, #tpu.memory_space<vmem>>, vector<16x128xf32>,
    } else {
    }
    return
  }
  func.func @transform_0(%arg0: i32, %arg1: i32) -> (i32, i32) {
    %c0_i32 = arith.constant 0 : i32
    %c0_i32_0 = arith.constant 0 : i32
    return %arg0, %c0_i32 : i32, i32
  }
  func.func @transform_1(%arg0: i32, %arg1: i32) -> (i32, i32) {
    %c0_i32 = arith.constant 0 : i32
    %c0_i32_0 = arith.constant 0 : i32
    return %c0_i32, %arg1 : i32, i32
  }
  func.func @transform_2(%arg0: i32, %arg1: i32) -> (i32, i32) {
    %c0_i32 = arith.constant 0 : i32
    %c0_i32_0 = arith.constant 0 : i32
    return %arg1, %c0_i32 : i32, i32
  }
  func.func @transform_3(%arg0: i32, %arg1: i32) -> (i32, i32) {
    %c0_i32 = arith.constant 0 : i32
    %c0_i32_0 = arith.constant 0 : i32
    return %arg0, %c0_i32 : i32, i32
  }
}

</mosaic_0001>

<bundles_post_ra>
// kernel: tpu_custom_call.1
= control target key start
LH: loop header
LB: loop body
LE: loop exit
PB: predicated region body
PF: predicated region fallthrough
CT: control target
= control target key end

     0   :  { %8 = vsyncpa [#allocation4], 0  ;;  %s922_s0 = inlined_call_operand.hbm [shape: f32[16,128], index: 0, kind: input, shape index: {}]   ;;  %s923_s1 = inlined_call_operand.hbm [shape: bf16[128,512], index: 1, kind: input, shape index: {}]   ;;  %s924_s2 = inlined_call_operand.hbm [shape: bf16[256,128], index: 2, kind: input, shape index: {}]   ;;  %s925_s3 = inlined_call_operand.hbm [shape: f32[16,128], index: 3, kind: output, shape index: {}]  }
   0x1   :  { %9 = vsyncpa [#allocation7], 0 }
   0x2   :  { %10 = vsyncpa [#allocation5], 0  ;;  %s837_s12 = smov [#allocation6]   ;;  %s743_s16 = scalar_lea.hbm %s923_s1, 4096 }
   0x3   :  { %s28_s13 = sshll.u32 %s837_s12, 4  ;;  %p744_p0 = scmp.ne.s32.totalorder %s923_s1, %s743_s16  ;;  %s29_s13 = int_to_ptr.vmem [resolvable:$true] %s28_s13 }
   0x4   :  { %p747_p1 = scmp.lt.u32.totalorder %s743_s16, %s923_s1 }
   0x6   :  { %p749_p2 = pnand %p747_p1, %p744_p0 }
   0x8   :  { %752 = shalt.err (!%p749_p2)
}
   0x9   :  { %s753_s21 = scalar_lea.vmem %s29_s13, 4096  ;;  %p758_p4 = scmp.lt.s32.totalorder %s29_s13, %s29_s13 }
   0xa   :  { %p754_p3 = scmp.ne.s32.totalorder %s29_s13, %s753_s21  ;;  %p759_p5 = scmp.lt.s32.totalorder %s753_s21, %s753_s21 }
   0xc   :  { %p760_p6 = por %p759_p5, %p758_p4 }
   0xe   :  { %p761_p7 = pnand %p760_p6, %p754_p3 }
  0x10   :  { %764 = shalt.err (!%p761_p7)
}
  0x11   :  { %s838_s22 = smov 256   ;;  %s839_s23 = smov 16  }
  0x12   :  { %34 = dma.hbm_to_vmem [thread:$0]  %s923_s1, 4096, %s29_s13, [#allocation7], %s838_s22, %s838_s22, %s839_s23  }
  0x13   :  { %s840_s26 = smov [#allocation3]   ;;  %s765_s30 = scalar_lea.hbm %s922_s0, 256 }
  0x14   :  { %s16_s27 = sshll.u32 %s840_s26, 4  ;;  %p766_p8 = scmp.ne.s32.totalorder %s922_s0, %s765_s30  ;;  %s17_s27 = int_to_ptr.vmem [resolvable:$true] %s16_s27 }
  0x15   :  { %p769_p9 = scmp.lt.u32.totalorder %s765_s30, %s922_s0 }
  0x17   :  { %p771_p10 = pnand %p769_p9, %p766_p8 }
  0x19   :  { %774 = shalt.err (!%p771_p10)
}
  0x1a   :  { %s775_s8 = scalar_lea.vmem %s17_s27, 256  ;;  %p780_p12 = scmp.lt.s32.totalorder %s17_s27, %s17_s27 }
  0x1b   :  { %p776_p11 = scmp.ne.s32.totalorder %s17_s27, %s775_s8  ;;  %p781_p13 = scmp.lt.s32.totalorder %s775_s8, %s775_s8 }
  0x1d   :  { %p782_p0 = por %p781_p13, %p780_p12 }
  0x1f   :  { %p783_p1 = pnand %p782_p0, %p776_p11 }
  0x21   :  { %786 = shalt.err (!%p783_p1)
}
  0x22   :  { %s841_s1 = smov 128   ;;  %s842_s9 = smov 8  }
  0x23   :  { %22 = dma.hbm_to_vmem [thread:$0]  %s922_s0, 256, %s17_s27, [#allocation4], %s841_s1, %s841_s1, %s842_s9  }
  0x24   :  { %s843_s12 = smov [#allocation8]   ;;  %s787_s16 = scalar_lea.hbm %s924_s2, 2048 }
  0x25   :  { %s40_s13 = sshll.u32 %s843_s12, 4  ;;  %p788_p2 = scmp.ne.s32.totalorder %s924_s2, %s787_s16  ;;  %s41_s13 = int_to_ptr.vmem [resolvable:$true] %s40_s13 }
  0x26   :  { %p791_p3 = scmp.lt.u32.totalorder %s787_s16, %s924_s2 }
  0x28   :  { %p793_p4 = pnand %p791_p3, %p788_p2 }
  0x2a   :  { %796 = shalt.err (!%p793_p4)
}
  0x2b   :  { %s797_s21 = scalar_lea.vmem %s41_s13, 2048  ;;  %p802_p6 = scmp.lt.s32.totalorder %s41_s13, %s41_s13 }
  0x2c   :  { %p798_p5 = scmp.ne.s32.totalorder %s41_s13, %s797_s21  ;;  %p803_p7 = scmp.lt.s32.totalorder %s797_s21, %s797_s21 }
  0x2e   :  { %p804_p8 = por %p803_p7, %p802_p6 }
  0x30   :  { %p805_p9 = pnand %p804_p8, %p798_p5 }
  0x32   :  { %808 = shalt.err (!%p805_p9)
}
  0x33   :  { %s844_s0 = smov 64   ;;  %s845_s22 = smov 4  }
  0x34   :  { %46 = dma.hbm_to_vmem [thread:$0]  %s924_s2, 2048, %s41_s13, [#allocation7], %s844_s0, %s844_s0, %s845_s22  }
  0x35   :  { %831 = dma.done.wait [#allocation4], 256  }
  0x36   :  { %832 = vsyncadd [#allocation4], 4294967040 }
  0x37   :  { %833 = dma.done.wait [#allocation7], 6144  }
  0x38   :  { %834 = vsyncadd [#allocation7], 4294961152  ;;  %v846_v0 = vmov 0   ;;  %v663_v1 = vld [vmem:[#allocation6 + $0x4] ss:$16 sps:$4 sm:$0xff]   ;;  %v64_v29 = vld [vmem:[#allocation3 + $0x8] sm:$0xff] }
  0x39   :  { %290 = vmatprep.mubr.bf16.mxu0 %v846_v0  ;;  %333 = vmatprep.mubr.bf16.mxu1 %v846_v0  ;;  %v665_v2 = vld [vmem:[#allocation6] ss:$16 sps:$4 sm:$0xff]   ;;  %v666_v3 = vld [vmem:[#allocation6 + $0x24] ss:$16 sps:$4 sm:$0xff]   ;;  %v684_v8 = vld [vmem:[#allocation6 + $0xc] ss:$16 sps:$4 sm:$0xff]  }
  0x3a   :  { %258 = vmatprep.subr.bf16.mxu0 %v663_v1  ;;  %v668_v4 = vld [vmem:[#allocation6 + $0x20] ss:$16 sps:$4 sm:$0xff]   ;;  %v669_v5 = vld [vmem:[#allocation6 + $0x44] ss:$16 sps:$4 sm:$0xff]   ;;  %v686_v9 = vld [vmem:[#allocation6 + $0x8] ss:$16 sps:$4 sm:$0xff]   ;;  %301 = vmatprep.subr.bf16.mxu1 %v684_v8 }
  0x3b   :  { %259 = vmatpush1.bf16.msra.mxu0 %v665_v2  ;;  %v671_v6 = vld [vmem:[#allocation6 + $0x40] ss:$16 sps:$4 sm:$0xff]   ;;  %v672_v7 = vld [vmem:[#allocation6 + $0x64] ss:$16 sps:$4 sm:$0xff]   ;;  %v690_v12 = vld [vmem:[#allocation6 + $0x2c] ss:$16 sps:$4 sm:$0xff]   ;;  %302 = vmatpush1.bf16.msra.mxu1 %v686_v9 }
  0x3c   :  { %260 = vmatprep.subr.bf16.mxu0 %v666_v3  ;;  %v674_v10 = vld [vmem:[#allocation6 + $0x60] ss:$16 sps:$4 sm:$0xff]   ;;  %v675_v11 = vld [vmem:[#allocation6 + $0x84] ss:$16 sps:$4 sm:$0xff]   ;;  %v692_v13 = vld [vmem:[#allocation6 + $0x28] ss:$16 sps:$4 sm:$0xff]   ;;  %303 = vmatprep.subr.bf16.mxu1 %v690_v12 }
  0x3d   :  { %v693_v14 = vld [vmem:[#allocation6 + $0x4c] ss:$16 sps:$4 sm:$0xff]   ;;  %v677_v15 = vld [vmem:[#allocation6 + $0x80] ss:$16 sps:$4 sm:$0xff]   ;;  %v678_v16 = vld [vmem:[#allocation6 + $0xa4] ss:$16 sps:$4 sm:$0xff]  }
  0x3e   :  { %v695_v17 = vld [vmem:[#allocation6 + $0x48] ss:$16 sps:$4 sm:$0xff]   ;;  %v696_v18 = vld [vmem:[#allocation6 + $0x6c] ss:$16 sps:$4 sm:$0xff]   ;;  %v680_v19 = vld [vmem:[#allocation6 + $0xa0] ss:$16 sps:$4 sm:$0xff]  }
  0x3f   :  { %261 = vmatpush1.bf16.msra.mxu0 %v668_v4  ;;  %304 = vmatpush1.bf16.msra.mxu1 %v692_v13  ;;  %v681_v20 = vld [vmem:[#allocation6 + $0xc4] ss:$16 sps:$4 sm:$0xff]   ;;  %v683_v21 = vld [vmem:[#allocation6 + $0xc0] ss:$16 sps:$4 sm:$0xff]   ;;  %v698_v22 = vld [vmem:[#allocation6 + $0x68] ss:$16 sps:$4 sm:$0xff]  }
  0x40   :  { %262 = vmatprep.subr.bf16.mxu0 %v669_v5  ;;  %305 = vmatprep.subr.bf16.mxu1 %v693_v14  ;;  %v699_v23 = vld [vmem:[#allocation6 + $0x8c] ss:$16 sps:$4 sm:$0xff]   ;;  %v687_v24 = vld [vmem:[#allocation6 + $0xe4] ss:$16 sps:$4 sm:$0xff]   ;;  %v701_v25 = vld [vmem:[#allocation6 + $0x88] ss:$16 sps:$4 sm:$0xff]  }
  0x41   :  { %v702_v26 = vld [vmem:[#allocation6 + $0xac] ss:$16 sps:$4 sm:$0xff]   ;;  %v689_v27 = vld [vmem:[#allocation6 + $0xe0] ss:$16 sps:$4 sm:$0xff]   ;;  %v704_v30 = vld [vmem:[#allocation6 + $0xa8] ss:$16 sps:$4 sm:$0xff]  }
  0x42   :  { %v63_v28 = vld [vmem:[#allocation3] sm:$0xff]  ;;  %v705_v31 = vld [vmem:[#allocation6 + $0xcc] ss:$16 sps:$4 sm:$0xff]   ;;  %v707_v33 = vld [vmem:[#allocation6 + $0xc8] ss:$16 sps:$4 sm:$0xff]   ;;  %s847_s2 = smov [#allocation9]  }
  0x43   :  { %263 = vmatpush1.bf16.msra.mxu0 %v671_v6  ;;  %306 = vmatpush1.bf16.msra.mxu1 %v695_v17  ;;  %v65_v32 = vpack.c.bf16 %v64_v29, %v63_v28  ;;  %v708_v34 = vld [vmem:[#allocation6 + $0xec] ss:$16 sps:$4 sm:$0xff]   ;;  %v710_v35 = vld [vmem:[#allocation6 + $0xe8] ss:$16 sps:$4 sm:$0xff]   ;;  %v711_v36 = vld [vmem:[#allocation8 + $0x40] sm:$0xff]   ;;  %s565_s25 = sshll.u32 %s847_s2, 4  ;;  %s566_s25 = int_to_ptr.vmem [resolvable:$true] %s565_s25 }
  0x44   :  { %264 = vmatprep.subr.bf16.mxu0 %v672_v7  ;;  %307 = vmatprep.subr.bf16.mxu1 %v696_v18  ;;  %v712_v37 = vld [vmem:[#allocation8] sm:$0xff]   ;;  %v713_v38 = vld [vmem:[#allocation8 + $0x48] sm:$0xff]   ;;  %v715_v40 = vld [vmem:[#allocation8 + $0x50] sm:$0xff]   ;;  %s809_s26 = scalar_lea.vmem %s566_s25, 256  ;;  %p814_p11 = scmp.lt.s32.totalorder %s566_s25, %s566_s25 }
  0x45   :  { %v714_v39 = vld [vmem:[#allocation8 + $0x8] sm:$0xff]   ;;  %v716_v41 = vld [vmem:[#allocation8 + $0x10] sm:$0xff]   ;;  %v717_v42 = vld [vmem:[#allocation8 + $0x58] sm:$0xff]   ;;  %p810_p10 = scmp.ne.s32.totalorder %s566_s25, %s809_s26  ;;  %p815_p12 = scmp.lt.s32.totalorder %s809_s26, %s809_s26 }
  0x46   :  { %v718_v43 = vld [vmem:[#allocation8 + $0x18] sm:$0xff]   ;;  %v719_v44 = vld [vmem:[#allocation8 + $0x60] sm:$0xff]   ;;  %v721_v46 = vld [vmem:[#allocation8 + $0x68] sm:$0xff]  }
  0x47   :  { %265 = vmatpush1.bf16.msra.mxu0 %v674_v10  ;;  %308 = vmatpush1.bf16.msra.mxu1 %v698_v22  ;;  %v720_v45 = vld [vmem:[#allocation8 + $0x20] sm:$0xff]   ;;  %v722_v47 = vld [vmem:[#allocation8 + $0x28] sm:$0xff]   ;;  %v723_v48 = vld [vmem:[#allocation8 + $0x70] sm:$0xff]   ;;  %p816_p13 = por %p815_p12, %p814_p11 }
  0x48   :  { %266 = vmatprep.subr.bf16.mxu0 %v675_v11  ;;  %309 = vmatprep.subr.bf16.mxu1 %v699_v23  ;;  %v724_v49 = vld [vmem:[#allocation8 + $0x30] sm:$0xff]   ;;  %v725_v50 = vld [vmem:[#allocation8 + $0x78] sm:$0xff]  }
  0x49   :  { %v726_v51 = vld [vmem:[#allocation8 + $0x38] sm:$0xff]   ;;  %p817_p0 = pnand %p816_p13, %p810_p10 }
  0x4b   :  { %267 = vmatpush1.bf16.msra.mxu0 %v677_v15  ;;  %310 = vmatpush1.bf16.msra.mxu1 %v701_v25 }
  0x4c   :  { %268 = vmatprep.subr.bf16.mxu0 %v678_v16  ;;  %311 = vmatprep.subr.bf16.mxu1 %v702_v26 }
  0x4f   :  { %269 = vmatpush1.bf16.msra.mxu0 %v680_v19  ;;  %312 = vmatpush1.bf16.msra.mxu1 %v704_v30 }
  0x50   :  { %270 = vmatprep.subr.bf16.mxu0 %v681_v20  ;;  %313 = vmatprep.subr.bf16.mxu1 %v705_v31 }
  0x53   :  { %271 = vmatpush1.bf16.msra.mxu0 %v683_v21  ;;  %314 = vmatpush1.bf16.msra.mxu1 %v707_v33 }
  0x54   :  { %272 = vmatprep.subr.bf16.mxu0 %v687_v24  ;;  %315 = vmatprep.subr.bf16.mxu1 %v708_v34 }
  0x57   :  { %273 = vmatpush1.bf16.msra.mxu0 %v689_v27  ;;  %316 = vmatpush1.bf16.msra.mxu1 %v710_v35 }
  0x58   :  { %630 = vmatprep.subr.bf16.mxu0 %v711_v36 }
  0x5a   :  { %291 = vmatmul.mubr.bf16.vlgmr.msra.gmra.mrb[0].mxu0 %v65_v32  ;;  %334 = vmatmul.mubr.bf16.vlgmr.msra.gmra.mrb[0].mxu1 %v65_v32 }
  0x5b   :  { %631 = vmatpush3.bf16.msra.mxu0 %v712_v37 }
  0x5c   :  { %632 = vmatprep.subr.bf16.mxu0 %v713_v38 }
  0x5f   :  { %633 = vmatpush3.bf16.msra.mxu0 %v714_v39 }
  0x60   :  { %634 = vmatprep.subr.bf16.mxu0 %v715_v40 }
  0x63   :  { %635 = vmatpush3.bf16.msra.mxu0 %v716_v41 }
  0x64   :  { %636 = vmatprep.subr.bf16.mxu0 %v717_v42 }
  0x67   :  { %637 = vmatpush3.bf16.msra.mxu0 %v718_v43 }
  0x68   :  { %638 = vmatprep.subr.bf16.mxu0 %v719_v44 }
  0x6b   :  { %639 = vmatpush3.bf16.msra.mxu0 %v720_v45 }
  0x6c   :  { %640 = vmatprep.subr.bf16.mxu0 %v721_v46 }
  0x6f   :  { %641 = vmatpush3.bf16.msra.mxu0 %v722_v47 }
  0x70   :  { %642 = vmatprep.subr.bf16.mxu0 %v723_v48 }
  0x73   :  { %643 = vmatpush3.bf16.msra.mxu0 %v724_v49 }
  0x74   :  { %644 = vmatprep.subr.bf16.mxu0 %v725_v50 }
  0x77   :  { %645 = vmatpush3.bf16.msra.mxu0 %v726_v51 }
 0x12d   :  { %v292_v52 = vpop.f32.mrb[0].mxu0  ;;  %v335_v60 = vpop.f32.mrb[0].mxu1 }
 0x12e   :  { %v610_v53 = vmul.f32 -1.442695, %v292_v52  ;;  %v294_v54 = vpop.f32.mrb[1].mxu0  ;;  %v337_v61 = vpop.f32.mrb[1].mxu1 }
 0x12f   :  { %v611_v55 = vmul.f32 -1.442695, %v294_v54  ;;  %v296_v56 = vpop.f32.mrb[2].mxu0  ;;  %v339_v62 = vpop.f32.mrb[2].mxu1 }
 0x130   :  { %727 = vpow2.f32 %v610_v53  ;;  %v612_v57 = vmul.f32 -1.442695, %v296_v56  ;;  %v298_v58 = vpop.f32.mrb[3].mxu0  ;;  %v341_v0 = vpop.f32.mrb[3].mxu1 }
 0x131   :  { %729 = vpow2.f32 %v611_v55  ;;  %v613_v59 = vmul.f32 -1.442695, %v298_v58 }
 0x132   :  { %731 = vpow2.f32 %v612_v57 }
 0x133   :  { %733 = vpow2.f32 %v613_v59 }
 0x13a   :  { %v728_v63 = vpop.eup %727 }
 0x13b   :  { %v730_v1 = vpop.eup %729  ;;  %v356_v2 = vadd.f32 1.0, %v728_v63 }
 0x13c   :  { %v732_v3 = vpop.eup %731  ;;  %v357_v4 = vadd.f32 1.0, %v730_v1 }
 0x13d   :  { %v734_v5 = vpop.eup %733  ;;  %735 = vrcp.f32 %v356_v2  ;;  %v358_v6 = vadd.f32 1.0, %v732_v3 }
 0x13e   :  { %737 = vrcp.f32 %v357_v4  ;;  %v359_v7 = vadd.f32 1.0, %v734_v5 }
 0x13f   :  { %739 = vrcp.f32 %v358_v6 }
 0x140   :  { %741 = vrcp.f32 %v359_v7 }
 0x147   :  { %v736_v8 = vpop.eup %735 }
 0x148   :  { %v738_v9 = vpop.eup %737  ;;  %v368_v10 = vmul.f32 %v736_v8, %v292_v52 }
 0x149   :  { %v740_v11 = vpop.eup %739  ;;  %v369_v12 = vmul.f32 %v738_v9, %v294_v54 }
 0x14a   :  { %v742_v13 = vpop.eup %741  ;;  %v370_v14 = vmul.f32 %v740_v11, %v296_v56  ;;  %v372_v15 = vmul.f32 %v368_v10, %v335_v60 }
 0x14b   :  { %v371_v16 = vmul.f32 %v742_v13, %v298_v58  ;;  %v373_v17 = vmul.f32 %v369_v12, %v337_v61 }
 0x14c   :  { %v374_v18 = vmul.f32 %v370_v14, %v339_v62 }
 0x14d   :  { %v375_v19 = vmul.f32 %v371_v16, %v341_v0 }
 0x14e   :  { %v378_v20 = vpack.c.bf16 %v374_v18, %v372_v15 }
 0x14f   :  { %v379_v21 = vpack.c.bf16 %v375_v19, %v373_v17 }
 0x151   :  { %540 = vmatprep.mubr.bf16.mxu0 %v379_v21 }
 0x152   :  { %541 = vmatmul.mubr.bf16.vlgmr.msra.gmra.mrb[4].mxu0 %v378_v20 }
 0x225   :  { %v646_v22 = vpop.f32.mrb[4].mxu0 }
 0x226   :  { %v647_v23 = vpop.f32.mrb[5].mxu0 }
 0x227   :  { %v648_v24 = vadd.f32 %v647_v23, %v646_v22  ;;  %v649_v25 = vpop.f32.mrb[6].mxu0 }
 0x228   :  { %v650_v26 = vpop.f32.mrb[7].mxu0 }
 0x229   :  { %558 = vst [vmem:[#allocation9] sm:$0xff] %v648_v24  ;;  %v651_v27 = vadd.f32 %v650_v26, %v649_v25 }
 0x22b   :  { %559 = vst [vmem:[#allocation9 + $0x8] sm:$0xff] %v651_v27 }
 0x22c   :  { %820 = shalt.err (!%p817_p0)
}
 0x22d   :  { %s821_s29 = scalar_lea.hbm %s925_s3, 256 }
 0x22e   :  { %p822_p1 = scmp.ne.s32.totalorder %s925_s3, %s821_s29  ;;  %p825_p2 = scmp.lt.u32.totalorder %s821_s29, %s925_s3 }
 0x230   :  { %p827_p3 = pnand %p825_p2, %p822_p1 }
 0x232   :  { %830 = shalt.err (!%p827_p3)
}
 0x233   :  { %571 = dma.vmem_to_hbm [thread:$0]  %s566_s25, 256, %s925_s3, [#allocation5], %s841_s1, %s841_s1, %s842_s9  }
 0x234   :  { %835 = dma.done.wait [#allocation5], 256  }
 0x235   :  { %836 = vsyncadd [#allocation5], 4294967040 }
 0x236   :  { %575 = vsyncpa [#allocation4], 1 }
 0x237   :  { %576 = vsyncpa [#allocation7], 1 }
 0x238   :  { %577 = vsyncpa [#allocation5], 1 }

</bundles_post_ra>
